<compile_context>
chip_gen: v7x
topology: tpu7x:2x2x1
jax: 0.10.0
libtpu: 0.0.40
codegen_flags: <defaults>
</compile_context>

<pallas_src>
import functools
import math

import jax
import jax.numpy as jnp
from jax import lax
from jax.experimental import pallas as pl
from jax.experimental.pallas import tpu as pltpu


def _round_up(x, m):
    return (x + m - 1) // m * m


def _pad2d(a, rows, cols):
    """Zero-pad a 2-D array up to (rows, cols); no-op if already that shape."""
    pr, pc = rows - a.shape[0], cols - a.shape[1]
    if pr == 0 and pc == 0:
        return a
    return jnp.pad(a, ((0, pr), (0, pc)))


def _lora_linear_kernel(x_ref, w_ref, t_ref, r_ref, b_ref, o_ref, acc_ref):
    """One (i, j, k) grid step of y = x @ W.T + (x @ L.T) @ (s*R).T + b."""
    k = pl.program_id(2)

    @pl.when(k == 0)
    def _():
        acc_ref[...] = jnp.zeros_like(acc_ref)

    # Base GEMM: (tm, tk) contracted with the native-(N, K) weight tile
    # (tn, tk) over K -> (tm, tn), f32 accumulation on the MXU, no transpose.
    acc_ref[...] += lax.dot_general(
        x_ref[...], w_ref[...], (((1,), (1,)), ((), ())),
        preferred_element_type=jnp.float32)

    @pl.when(k == pl.num_programs(2) - 1)
    def _():
        # Rank-r LoRA correction + bias, applied once per output tile.
        # t = x @ L.T is precomputed in the wrapper (independent of j, k);
        # the lora scaling is folded into R, so this is just t @ R.T.
        corr = lax.dot_general(
            t_ref[...], r_ref[...], (((1,), (1,)), ((), ())),
            preferred_element_type=jnp.float32)
        y = acc_ref[...] + corr + b_ref[...].astype(jnp.float32)
        o_ref[...] = y.astype(o_ref.dtype)


def lora_linear(x, weight, bias, lora_right, lora_left, lora_scaling, lora_dim,
                *, tm=512, tn=512, tk=1024):
    """Pallas implementation of LoRALinear.forward.

    x: (..., in_features); weight: (out_features, in_features);
    lora_right: (out_features, lora_dim); lora_left: (lora_dim, in_features);
    bias: (out_features,).
    """
    scaling = float(lora_scaling) / float(lora_dim)
    N, K = weight.shape
    r = lora_right.shape[1]

    lead_shape = x.shape[:-1]
    x2d = x.reshape(-1, K)
    M = x2d.shape[0]

    out_dtype = x.dtype
    itemsize = jnp.dtype(x.dtype).itemsize
    w_itemsize = jnp.dtype(weight.dtype).itemsize
    # dtype-aware sublane multiple: 8 (f32), 16 (bf16), 32 (int8/fp8).
    sub = max(8, 32 // itemsize)

    # Clamp tiles to the (aligned) problem size; keep (sub, 128) alignment.
    tm = min(tm, _round_up(M, sub))
    tn = min(tn, _round_up(N, 128))
    tk = min(tk, _round_up(K, 128))

    M_p = _round_up(M, tm)
    N_p = _round_up(N, tn)
    K_p = _round_up(K, tk)

    # --- LoRA pre-pass (hoisted out of the grid): t = x @ L.T, shape (M, r).
    # Tiny (rank-r output) matmul; scaling is folded into R below.
    t = jnp.dot(x2d, lora_left.T,
                preferred_element_type=jnp.float32).astype(x.dtype)
    r_scaled = (lora_right.astype(jnp.float32) * scaling).astype(weight.dtype)

    # Zero padding is exact (padded K contributes 0; padded M/N sliced off),
    # and is skipped entirely when shapes already divide the tiles.
    x_p = _pad2d(x2d, M_p, K_p)
    w_p = _pad2d(weight, N_p, K_p)
    t_p = _pad2d(t, M_p, r)
    r_p = _pad2d(r_scaled, N_p, r)
    b_p = _pad2d(bias.reshape(1, N), 1, N_p)

    grid = (M_p // tm, N_p // tn, K_p // tk)
    gm, gn, gk = grid

    # Advisory cost estimate: account for W re-reads across the M grid and
    # x re-reads across the N grid.
    cost = pl.CostEstimate(
        flops=2 * M_p * N_p * K_p + 2 * M_p * N_p * r,
        transcendentals=0,
        bytes_accessed=int(
            M_p * K_p * gn * itemsize       # x, re-read per N tile
            + N_p * K_p * gm * w_itemsize   # W, re-read per M tile
            + M_p * N_p * itemsize          # output
            + (M_p * r * gn + N_p * r * gm + N_p * gm) * itemsize),
    )

    # Double-buffered working-set estimate; only raise the scoped-VMEM limit
    # when the chosen tiling actually needs it (cap below v7x's 64 MiB).
    est_vmem = (2 * (tm * tk * itemsize + tn * tk * w_itemsize)   # x, W
                + 2 * tm * tn * itemsize                          # out
                + tm * tn * 4                                     # f32 acc
                + 2 * (tm * r + tn * r + tn) * itemsize)          # t, R, bias
    vmem_limit = None
    if est_vmem > 12 * 1024 * 1024:
        vmem_limit = min(int(est_vmem * 7 // 4), 48 * 1024 * 1024)

    out = pl.pallas_call(
        _lora_linear_kernel,
        out_shape=jax.ShapeDtypeStruct((M_p, N_p), out_dtype),
        grid_spec=pltpu.PrefetchScalarGridSpec(
            num_scalar_prefetch=0,
            grid=grid,
            in_specs=[
                pl.BlockSpec((tm, tk), lambda i, j, k: (i, k)),   # x
                pl.BlockSpec((tn, tk), lambda i, j, k: (j, k)),   # W (native N,K)
                pl.BlockSpec((tm, r), lambda i, j, k: (i, 0)),    # t = x @ L.T
                pl.BlockSpec((tn, r), lambda i, j, k: (j, 0)),    # s * lora_right
                pl.BlockSpec((1, tn), lambda i, j, k: (0, j)),    # bias
            ],
            out_specs=pl.BlockSpec((tm, tn), lambda i, j, k: (i, j)),
            scratch_shapes=[
                pltpu.VMEM((tm, tn), jnp.float32),   # f32 accumulator
            ],
        ),
        compiler_params=pltpu.CompilerParams(
            dimension_semantics=("parallel", "parallel", "arbitrary"),
            vmem_limit_bytes=vmem_limit,
        ),
        cost_estimate=cost,
    )(x_p, w_p, t_p, r_p, b_p)

    return out[:M, :N].reshape(*lead_shape, N)


if __name__ == "__main__":
    # Small shapes consistent with the module.
    batch, seq = 2, 8
    in_features, out_features = 32, 64
    lora_dim = 4
    lora_scaling = 2.0

    key = jax.random.PRNGKey(0)
    k_x, k_w, k_b, k_r, k_l = jax.random.split(key, 5)

    # Deterministic synthetic params (mirrors shapes from __init__).
    # NOTE: the module zero-inits lora_right; nonzero here so the LoRA path is
    # actually exercised numerically.
    bound_w = 1.0 / math.sqrt(in_features)
    weight = jax.random.uniform(
        k_w, (out_features, in_features), jnp.float32, -bound_w, bound_w)
    bias = jax.random.uniform(k_b, (out_features,), jnp.float32, -bound_w, bound_w)
    lora_right = jax.random.uniform(
        k_r, (out_features, lora_dim), jnp.float32, -0.5, 0.5)
    bound_l = math.sqrt(6.0 / in_features)
    lora_left = jax.random.uniform(
        k_l, (lora_dim, in_features), jnp.float32, -bound_l, bound_l)

    x = jax.random.normal(k_x, (batch, seq, in_features), jnp.float32)

    y = lora_linear(x, weight, bias, lora_right, lora_left, lora_scaling, lora_dim)
    y = jax.block_until_ready(y)

    scaling = lora_scaling / lora_dim
    w_eff = weight + scaling * (lora_right @ lora_left)
    y_ref = x @ w_eff.T + bias
    assert y.shape == (batch, seq, out_features)
    assert jnp.allclose(y, y_ref, atol=1e-4, rtol=1e-4), \
        float(jnp.max(jnp.abs(y - y_ref)))

    # Second config exercising multi-tile M, multi-step K accumulation, and
    # the pad-free fast path (all dims divide the tiles).
    in2, out2, r2 = 256, 128, 8
    kk = jax.random.split(jax.random.PRNGKey(1), 5)
    w2 = jax.random.uniform(kk[0], (out2, in2), jnp.float32, -0.05, 0.05)
    b2 = jax.random.uniform(kk[1], (out2,), jnp.float32, -0.05, 0.05)
    r2w = jax.random.uniform(kk[2], (out2, r2), jnp.float32, -0.2, 0.2)
    l2w = jax.random.uniform(kk[3], (r2, in2), jnp.float32, -0.2, 0.2)
    x2 = jax.random.normal(kk[4], (2, 16, in2), jnp.float32)
    y2 = lora_linear(x2, w2, b2, r2w, l2w, 4.0, r2, tm=16, tn=128, tk=128)
    y2 = jax.block_until_ready(y2)
    y2_ref = x2 @ (w2 + (4.0 / r2) * (r2w @ l2w)).T + b2
    assert jnp.allclose(y2, y2_ref, atol=1e-4, rtol=1e-4), \
        float(jnp.max(jnp.abs(y2 - y2_ref)))

    print("KERNEL_OK")
</pallas_src>

<mosaic_0001>
module attributes {stable_mosaic.version = 11 : i64} {
  func.func @_lora_linear_kernel(%arg0: i32, %arg1: i32, %arg2: i32, %arg3: memref<16x128xf32, #tpu.memory_space<vmem>>, %arg4: memref<128x128xf32, #tpu.memory_space<vmem>>, %arg5: memref<16x4xf32, #tpu.memory_space<vmem>>, %arg6: memref<128x4xf32, #tpu.memory_space<vmem>>, %arg7: memref<1x128xf32, #tpu.memory_space<vmem>>, %arg8: memref<16x128xf32, #tpu.memory_space<vmem>>, %arg9: memref<16x128xf32, #tpu.memory_space<vmem>>) attributes {dimension_semantics = [#tpu.dimension_semantics<parallel>, #tpu.dimension_semantics<parallel>, #tpu.dimension_semantics<arbitrary>], iteration_bounds = array<i64: 1, 1, 1>, scalar_prefetch = 0 : i64, scratch_operands = 1 : i64, tpu.core_type = #tpu.core_type<tc>, window_params = [{transform_indices = @transform_0, window_bounds = array<i64: 16, 128>}, {transform_indices = @transform_1, window_bounds = array<i64: 128, 128>}, {transform_indices = @transform_2, window_bounds = array<i64: 16, 4>}, {transform_indices = @transform_3, window_bounds = array<i64: 128, 4>}, {transform_indices = @transform_4, window_bounds = array<i64: 1, 128>}, {transform_indices = @transform_5, window_bounds = array<i64: 16, 128>}]} {
    %c0_i32 = arith.constant 0 : i32
    %0 = arith.cmpi eq, %arg2, %c0_i32 : i32
    %1 = arith.extui %0 : i1 to i32
    %c0_i32_0 = arith.constant 0 : i32
    %2 = arith.cmpi ne, %1, %c0_i32_0 : i32
    scf.if %2 {
      %cst_10 = arith.constant 0.000000e+00 : f32
      %12 = vector.broadcast %cst_10 : f32 to vector<16x128xf32>
      %c0_11 = arith.constant 0 : index
      %c0_12 = arith.constant 0 : index
      %13 = vector.load %arg9[%c0_11, %c0_12] : memref<16x128xf32, #tpu.memory_space<vmem>>, vector<16x128xf32>
      tpu.vector_store %arg9[%c0_11, %c0_12], %12 {strides = array<i32>} : memref<16x128xf32, #tpu.memory_space<vmem>>, vector<16x128xf32>,
    } else {
    }
    %c0 = arith.constant 0 : index
    %c0_1 = arith.constant 0 : index
    %3 = vector.load %arg9[%c0, %c0_1] : memref<16x128xf32, #tpu.memory_space<vmem>>, vector<16x128xf32>
    %c0_2 = arith.constant 0 : index
    %c0_3 = arith.constant 0 : index
    %4 = vector.load %arg3[%c0_2, %c0_3] : memref<16x128xf32, #tpu.memory_space<vmem>>, vector<16x128xf32>
    %c0_4 = arith.constant 0 : index
    %c0_5 = arith.constant 0 : index
    %5 = vector.load %arg4[%c0_4, %c0_5] : memref<128x128xf32, #tpu.memory_space<vmem>>, vector<128x128xf32>
    %cst = arith.constant dense<0.000000e+00> : vector<16x128xf32>
    %6 = tpu.matmul %4, %5, %cst {dimension_numbers = #tpu.dot_dimension_numbers<[1], [1], [0], [0], [0, 0, 1, 0], [], []>} : vector<16x128xf32>, vector<128x128xf32>, vector<16x128xf32> -> vector<16x128xf32>
    %7 = arith.addf %3, %6 : vector<16x128xf32>
    %c0_6 = arith.constant 0 : index
    %c0_7 = arith.constant 0 : index
    %8 = vector.load %arg9[%c0_6, %c0_7] : memref<16x128xf32, #tpu.memory_space<vmem>>, vector<16x128xf32>
    tpu.vector_store %arg9[%c0_6, %c0_7], %7 {strides = array<i32>} : memref<16x128xf32, #tpu.memory_space<vmem>>, vector<16x128xf32>,
    %c0_i32_8 = arith.constant 0 : i32
    %9 = arith.cmpi eq, %arg2, %c0_i32_8 : i32
    %10 = arith.extui %9 : i1 to i32
    %c0_i32_9 = arith.constant 0 : i32
    %11 = arith.cmpi ne, %10, %c0_i32_9 : i32
    scf.if %11 {
      %c0_10 = arith.constant 0 : index
      %c0_11 = arith.constant 0 : index
      %12 = vector.load %arg5[%c0_10, %c0_11] : memref<16x4xf32, #tpu.memory_space<vmem>>, vector<16x4xf32>
      %c0_12 = arith.constant 0 : index
      %c0_13 = arith.constant 0 : index
      %13 = vector.load %arg6[%c0_12, %c0_13] : memref<128x4xf32, #tpu.memory_space<vmem>>, vector<128x4xf32>
      %cst_14 = arith.constant dense<0.000000e+00> : vector<16x128xf32>
      %14 = tpu.matmul %12, %13, %cst_14 {dimension_numbers = #tpu.dot_dimension_numbers<[1], [1], [0], [0], [0, 0, 1, 0], [], []>} : vector<16x4xf32>, vector<128x4xf32>, vector<16x128xf32> -> vector<16x128xf32>
      %c0_15 = arith.constant 0 : index
      %c0_16 = arith.constant 0 : index
      %15 = vector.load %arg9[%c0_15, %c0_16] : memref<16x128xf32, #tpu.memory_space<vmem>>, vector<16x128xf32>
      %16 = arith.addf %15, %14 : vector<16x128xf32>
      %c0_17 = arith.constant 0 : index
      %c0_18 = arith.constant 0 : index
      %17 = vector.load %arg7[%c0_17, %c0_18] : memref<1x128xf32, #tpu.memory_space<vmem>>, vector<1x128xf32>
      %18 = vector.broadcast %17 : vector<1x128xf32> to vector<16x128xf32>
      %19 = arith.addf %16, %18 : vector<16x128xf32>
      %c0_19 = arith.constant 0 : index
      %c0_20 = arith.constant 0 : index
      %20 = vector.load %arg8[%c0_19, %c0_20] : memref<16x128xf32, #tpu.memory_space<vmem>>, vector<16x128xf32>
      tpu.vector_store %arg8[%c0_19, %c0_20], %19 {strides = array<i32>} : memref<16x128xf32, #tpu.memory_space<vmem>>, vector<16x128xf32>,
    } else {
    }
    return
  }
  func.func @transform_0(%arg0: i32, %arg1: i32, %arg2: i32) -> (i32, i32) {
    %c0_i32 = arith.constant 0 : i32
    return %arg0, %arg2 : i32, i32
  }
  func.func @transform_1(%arg0: i32, %arg1: i32, %arg2: i32) -> (i32, i32) {
    %c0_i32 = arith.constant 0 : i32
    return %arg1, %arg2 : i32, i32
  }
  func.func @transform_2(%arg0: i32, %arg1: i32, %arg2: i32) -> (i32, i32) {
    %c0_i32 = arith.constant 0 : i32
    %c0_i32_0 = arith.constant 0 : i32
    return %arg0, %c0_i32 : i32, i32
  }
  func.func @transform_3(%arg0: i32, %arg1: i32, %arg2: i32) -> (i32, i32) {
    %c0_i32 = arith.constant 0 : i32
    %c0_i32_0 = arith.constant 0 : i32
    return %arg1, %c0_i32 : i32, i32
  }
  func.func @transform_4(%arg0: i32, %arg1: i32, %arg2: i32) -> (i32, i32) {
    %c0_i32 = arith.constant 0 : i32
    %c0_i32_0 = arith.constant 0 : i32
    return %c0_i32, %arg1 : i32, i32
  }
  func.func @transform_5(%arg0: i32, %arg1: i32, %arg2: i32) -> (i32, i32) {
    %c0_i32 = arith.constant 0 : i32
    return %arg0, %arg1 : i32, i32
  }
}

</mosaic_0001>

<bundles_post_ra>
// kernel: tpu_custom_call.1
= control target key start
LH: loop header
LB: loop body
LE: loop exit
PB: predicated region body
PF: predicated region fallthrough
CT: control target
= control target key end

     0   :  { %vm147_vm0 = vcmask 31744   ;;  %s738_s0 = inlined_call_operand.vmem [shape: f32[16,128], index: 0, kind: input, shape index: {}]   ;;  %s739_s1 = inlined_call_operand.vmem [shape: f32[128,128], index: 1, kind: input, shape index: {}]   ;;  %s740_s2 = inlined_call_operand.vmem [shape: f32[16,4], index: 2, kind: input, shape index: {}]   ;;  %s741_s3 = inlined_call_operand.vmem [shape: f32[128,4], index: 3, kind: input, shape index: {}]   ;;  %s742_s4 = inlined_call_operand.vmem [shape: f32[1,128], index: 4, kind: input, shape index: {}]   ;;  %s743_s5 = inlined_call_operand.hbm [shape: f32[16,128], index: 5, kind: output, shape index: {}]  }
   0x1   :  { %v31_v0 = vld [vmem:[%s739_s1] sm:$0xff]  ;;  %v32_v1 = vld [vmem:[%s739_s1 + $0x8] sm:$0xff]  ;;  %vm589_vm1 = vmpackc.low %vm147_vm0, %vm147_vm0 }
   0x2   :  { %v131_v2 = vld [vmem:[%s741_s3] sm:$0xff]  ;;  %v433_v3 = vpack.c.bf16 %v32_v1, %v31_v0  ;;  %v132_v4 = vld [vmem:[%s741_s3 + $0x8] sm:$0xff]  ;;  %v33_v6 = vld [vmem:[%s739_s1 + $0x10] sm:$0xff] }
   0x3   :  { %v465_v7 = vpack.c.bf16 %v132_v4, %v131_v2  ;;  %v34_v8 = vld [vmem:[%s739_s1 + $0x18] sm:$0xff]  ;;  %v133_v9 = vld [vmem:[%s741_s3 + $0x10] sm:$0xff]  ;;  %v35_v13 = vld [vmem:[%s739_s1 + $0x20] sm:$0xff] }
   0x4   :  { %v134_v10 = vld [vmem:[%s741_s3 + $0x18] sm:$0xff]  ;;  %434 = vmatprep.subr.bf16.mxu1 %v433_v3  ;;  %v437_v11 = vpack.c.bf16 %v34_v8, %v33_v6  ;;  %v36_v14 = vld [vmem:[%s739_s1 + $0x28] sm:$0xff]  ;;  %v135_v15 = vld [vmem:[%s741_s3 + $0x20] sm:$0xff] }
   0x5   :  { %v471_v12 = vpack.c.bf16 %v134_v10, %v133_v9  ;;  %467 = vmatprep.subr.msk.bf16.mxu0 %vm589_vm1, %v465_v7  ;;  %436 = vmatpush3.bf16.xpose.msra.mxu1 %v433_v3  ;;  %v136_v16 = vld [vmem:[%s741_s3 + $0x28] sm:$0xff]  ;;  %v441_v17 = vpack.c.bf16 %v36_v14, %v35_v13  ;;  %v29_v19 = vld [vmem:[%s738_s0] sm:$0xff] }
   0x6   :  { %470 = vmatpush3.bf16.xpose.msk.msra.mxu0 %vm589_vm1, %v465_v7  ;;  %438 = vmatprep.subr.bf16.mxu1 %v437_v11  ;;  %v477_v18 = vpack.c.bf16 %v136_v16, %v135_v15  ;;  %v129_v20 = vld [vmem:[%s740_s2] sm:$0xff] }
   0x7   :  { %473 = vmatprep.subr.msk.bf16.mxu0 %vm589_vm1, %v471_v12  ;;  %395 = vmatprep.mubr.f32.mxu1 %v29_v19 }
   0xd   :  { %440 = vmatpush3.bf16.xpose.msra.mxu1 %v437_v11 }
   0xe   :  { %10 = vsyncpa [#allocation4], 0  ;;  %476 = vmatpush3.bf16.xpose.msk.msra.mxu0 %vm589_vm1, %v471_v12  ;;  %442 = vmatprep.subr.bf16.mxu1 %v441_v17  ;;  %v37_v21 = vld [vmem:[%s739_s1 + $0x30] sm:$0xff]  ;;  %v38_v22 = vld [vmem:[%s739_s1 + $0x38] sm:$0xff]  ;;  %s542_s15 = smov [#allocation3]  }
   0xf   :  { %479 = vmatprep.subr.msk.bf16.mxu0 %vm589_vm1, %v477_v18  ;;  %430 = vmatprep.mubr.msk.f32.mxu0 %vm147_vm0, %v129_v20  ;;  %v137_v23 = vld [vmem:[%s741_s3 + $0x30] sm:$0xff]  ;;  %v138_v24 = vld [vmem:[%s741_s3 + $0x38] sm:$0xff]  ;;  %v445_v25 = vpack.c.bf16 %v38_v22, %v37_v21  ;;  %v39_v27 = vld [vmem:[%s739_s1 + $0x40] sm:$0xff]  ;;  %s297_s16 = sshll.u32 %s542_s15, 4  ;;  %s298_s16 = int_to_ptr.vmem [resolvable:$true] %s297_s16 }
  0x10   :  { %v483_v26 = vpack.c.bf16 %v138_v24, %v137_v23  ;;  %v40_v28 = vld [vmem:[%s739_s1 + $0x48] sm:$0xff]  ;;  %v139_v29 = vld [vmem:[%s741_s3 + $0x40] sm:$0xff]  ;;  %v41_v33 = vld [vmem:[%s739_s1 + $0x50] sm:$0xff]  ;;  %p523_p1 = scmp.lt.s32.totalorder %s298_s16, %s298_s16 }
  0x11   :  { %v140_v30 = vld [vmem:[%s741_s3 + $0x48] sm:$0xff]  ;;  %v449_v31 = vpack.c.bf16 %v40_v28, %v39_v27  ;;  %v42_v34 = vld [vmem:[%s739_s1 + $0x58] sm:$0xff]  ;;  %v141_v35 = vld [vmem:[%s741_s3 + $0x50] sm:$0xff] }
  0x12   :  { %v489_v32 = vpack.c.bf16 %v140_v30, %v139_v29  ;;  %v142_v36 = vld [vmem:[%s741_s3 + $0x58] sm:$0xff]  ;;  %v453_v37 = vpack.c.bf16 %v42_v34, %v41_v33  ;;  %v43_v39 = vld [vmem:[%s739_s1 + $0x60] sm:$0xff]  ;;  %v44_v40 = vld [vmem:[%s739_s1 + $0x68] sm:$0xff] }
  0x13   :  { %v495_v38 = vpack.c.bf16 %v142_v36, %v141_v35  ;;  %v143_v41 = vld [vmem:[%s741_s3 + $0x60] sm:$0xff]  ;;  %v144_v42 = vld [vmem:[%s741_s3 + $0x68] sm:$0xff]  ;;  %v457_v43 = vpack.c.bf16 %v44_v40, %v43_v39  ;;  %v45_v45 = vld [vmem:[%s739_s1 + $0x70] sm:$0xff] }
  0x14   :  { %v501_v44 = vpack.c.bf16 %v144_v42, %v143_v41  ;;  %v46_v46 = vld [vmem:[%s739_s1 + $0x78] sm:$0xff]  ;;  %v145_v47 = vld [vmem:[%s741_s3 + $0x70] sm:$0xff]  ;;  %v30_v51 = vld [vmem:[%s738_s0 + $0x8] sm:$0xff]  ;;  %s518_s0 = scalar_lea.vmem %s298_s16, 256 }
  0x15   :  { %444 = vmatpush3.bf16.xpose.msra.mxu1 %v441_v17  ;;  %v146_v48 = vld [vmem:[%s741_s3 + $0x78] sm:$0xff]  ;;  %v461_v49 = vpack.c.bf16 %v46_v46, %v45_v45  ;;  %v130_v52 = vld [vmem:[%s740_s2 + $0x8] sm:$0xff]  ;;  %v326_v55 = vld [vmem:[%s742_s4] ss:$0 sm:$0xff]  ;;  %p519_p0 = scmp.ne.s32.totalorder %s298_s16, %s518_s0  ;;  %p524_p2 = scmp.lt.s32.totalorder %s518_s0, %s518_s0 }
  0x16   :  { %482 = vmatpush3.bf16.xpose.msk.msra.mxu0 %vm589_vm1, %v477_v18  ;;  %446 = vmatprep.subr.bf16.mxu1 %v445_v25  ;;  %v507_v50 = vpack.c.bf16 %v146_v48, %v145_v47 }
  0x17   :  { %485 = vmatprep.subr.msk.bf16.mxu0 %vm589_vm1, %v483_v26  ;;  %p525_p3 = por %p524_p2, %p523_p1 }
  0x19   :  { %p526_p4 = pnand %p525_p3, %p519_p0 }
  0x1d   :  { %448 = vmatpush3.bf16.xpose.msra.mxu1 %v445_v25 }
  0x1e   :  { %488 = vmatpush3.bf16.xpose.msk.msra.mxu0 %vm589_vm1, %v483_v26  ;;  %450 = vmatprep.subr.bf16.mxu1 %v449_v31 }
  0x1f   :  { %491 = vmatprep.subr.msk.bf16.mxu0 %vm589_vm1, %v489_v32 }
  0x25   :  { %452 = vmatpush3.bf16.xpose.msra.mxu1 %v449_v31 }
  0x26   :  { %494 = vmatpush3.bf16.xpose.msk.msra.mxu0 %vm589_vm1, %v489_v32  ;;  %454 = vmatprep.subr.bf16.mxu1 %v453_v37 }
  0x27   :  { %497 = vmatprep.subr.msk.bf16.mxu0 %vm589_vm1, %v495_v38 }
  0x2d   :  { %456 = vmatpush3.bf16.xpose.msra.mxu1 %v453_v37 }
  0x2e   :  { %500 = vmatpush3.bf16.xpose.msk.msra.mxu0 %vm589_vm1, %v495_v38  ;;  %458 = vmatprep.subr.bf16.mxu1 %v457_v43 }
  0x2f   :  { %503 = vmatprep.subr.msk.bf16.mxu0 %vm589_vm1, %v501_v44 }
  0x35   :  { %460 = vmatpush3.bf16.xpose.msra.mxu1 %v457_v43 }
  0x36   :  { %506 = vmatpush3.bf16.xpose.msk.msra.mxu0 %vm589_vm1, %v501_v44  ;;  %462 = vmatprep.subr.bf16.mxu1 %v461_v49 }
  0x37   :  { %509 = vmatprep.subr.msk.bf16.mxu0 %vm589_vm1, %v507_v50 }
  0x3d   :  { %464 = vmatpush3.bf16.xpose.msra.mxu1 %v461_v49 }
  0x3e   :  { %512 = vmatpush3.bf16.xpose.msk.msra.mxu0 %vm589_vm1, %v507_v50 }
  0x44   :  { %396 = vmatmul.mubr.f32.vlgmr.msra.gmra.mrb[0].mxu1 %v30_v51 }
  0x45   :  { %431 = vmatmul.mubr.msk.f32.vlgmr.msra.gmra.mrb[0].mxu0 %vm147_vm0, %v130_v52 }
 0x117   :  { %v397_v53 = vpop.f32.mrb[0].mxu1 }
 0x118   :  { %v432_v54 = vpop.f32.mrb[0].mxu0  ;;  %v113_v56 = vpop.f32.mrb[1].mxu1 }
 0x119   :  { %v280_v57 = vadd.f32 %v432_v54, %v397_v53  ;;  %v268_v58 = vpop.f32.mrb[1].mxu0 }
 0x11a   :  { %v279_v59 = vadd.f32 %v268_v58, %v113_v56 }
 0x11b   :  { %v289_v60 = vadd.f32 %v326_v55, %v280_v57 }
 0x11c   :  { %v288_v61 = vadd.f32 %v326_v55, %v279_v59 }
 0x11d   :  { %291 = vst [vmem:[#allocation3 + $0x8] sm:$0xff] %v289_v60 }
 0x11e   :  { %290 = vst [vmem:[#allocation3] sm:$0xff] %v288_v61 }
 0x11f   :  { %529 = shalt.err (!%p526_p4)
}
 0x120   :  { %s530_s17 = scalar_lea.hbm %s743_s5, 256 }
 0x121   :  { %p531_p5 = scmp.ne.s32.totalorder %s743_s5, %s530_s17  ;;  %p534_p6 = scmp.lt.u32.totalorder %s530_s17, %s743_s5 }
 0x123   :  { %p536_p7 = pnand %p534_p6, %p531_p5 }
 0x125   :  { %539 = shalt.err (!%p536_p7)
}
 0x126   :  { %s543_s22 = smov 128   ;;  %s544_s23 = smov 8  }
 0x127   :  { %303 = dma.vmem_to_hbm [thread:$0]  %s298_s16, 256, %s743_s5, [#allocation4], %s543_s22, %s543_s22, %s544_s23  }
 0x128   :  { %540 = dma.done.wait [#allocation4], 256  }
 0x129   :  { %541 = vsyncadd [#allocation4], 4294967040 }
 0x12a   :  { %307 = vsyncpa [#allocation4], 1 }

</bundles_post_ra>
